<compile_context>
chip_gen: v6e
topology: v6e:2x2x1
jax: 0.10.0
libtpu: 0.0.40
codegen_flags: <defaults>
</compile_context>

<pallas_src>
import jax
import jax.numpy as jnp
import numpy as np
from jax.experimental import pallas as pl
from jax.experimental.pallas import tpu as pltpu

_LANES = 128                               # lanes per vreg
_TARGET_BLOCK_BYTES = 4 * 1024 * 1024      # ~4 MiB of x (+ scale) per grid step
_SCALE_PAD_BYTES = 8 * 128 * 4             # padded per-sample VMEM tile of the scale operand


def _drop_path_kernel(scale_ref, x_ref, o_ref):
    """scale_ref: (BT,1,1) per-sample scale in x.dtype; x_ref/o_ref: (BT,SUB,TN)."""
    o_ref[...] = x_ref[...] * scale_ref[...]


def drop_path(x, *, drop_prob=0.0, scale_by_keep=True, training=True, key=None):
    """Pallas implementation of timm-style DropPath.forward (any input rank)."""
    # Same short-circuit as the PyTorch module.
    if drop_prob == 0.0 or not training:
        return x
    if key is None:
        raise ValueError("drop_path: `key` is required when training with drop_prob > 0")

    keep_prob = 1.0 - drop_prob
    B = x.shape[0]
    feat = int(np.prod(x.shape[1:]))

    itemsize = int(jnp.dtype(x.dtype).itemsize)
    sub = max(8, 32 // itemsize)           # 8 (f32) / 16 (bf16) / 32 (int8, fp8)
    # Max lane-tile width so one sample-row tile alone never exceeds the target.
    max_tn = max(_LANES, (_TARGET_BLOCK_BYTES // (sub * itemsize)) // _LANES * _LANES)

    # Per-sample Bernoulli(keep_prob) scale (the bernoulli_ + div_ of the
    # reference), precomputed once in the wrapper, delivered in x.dtype so the
    # kernel is a single fused multiply.
    u = jax.random.uniform(key, (B,), dtype=jnp.float32)
    scale = (u < jnp.float32(keep_prob)).astype(jnp.float32)
    if scale_by_keep and keep_prob > 0.0:
        scale = scale * jnp.float32(1.0 / keep_prob)
    scale3 = scale.astype(x.dtype).reshape(B, 1, 1)

    # Layout: view each sample as (sub, F) so tiles fill all sublanes. Only pad
    # when feat % sub != 0 (rare); pad further to a 128-multiple only if the
    # per-sample slab is too wide to keep as a single full-extent tile.
    pad = (-feat) % sub
    F = (feat + pad) // sub
    if F > max_tn and F % _LANES != 0:
        pad = (-feat) % (sub * _LANES)
        F = (feat + pad) // sub
    feat_p = feat + pad

    xf = x.reshape(B, feat)
    if pad:
        # TODO(synk): the non-sub-aligned fallback pays an extra pad + slice HBM
        # pass over x; handle the ragged tail with a masked store if that shape
        # ever matters.
        xf = jnp.pad(xf, ((0, 0), (0, pad)))
    x3 = xf.reshape(B, sub, F)

    # Tile sizes, chosen in BYTES: lane tile TN first, then batch tile BT fills
    # the block to the target, accounting for the scale operand's padded tile.
    if F % _LANES == 0:
        TN = min(F, max_tn)
    else:
        TN = F                              # small, non-128-aligned: full extent
    per_sample_bytes = sub * TN * itemsize + _SCALE_PAD_BYTES
    BT = max(1, min(B, _TARGET_BLOCK_BYTES // per_sample_bytes))

    # Keep >= 2 grid steps along a "parallel" axis so both v7x TensorCores run
    # (neutral on single-core v5e/v6e; never collapse to grid=(1,1) if avoidable).
    if pl.cdiv(B, BT) * pl.cdiv(F, TN) < 2:
        if B >= 2:
            BT = pl.cdiv(B, 2)
        elif F % _LANES == 0 and F >= 2 * _LANES:
            TN = (F // (2 * _LANES)) * _LANES
    grid = (pl.cdiv(B, BT), pl.cdiv(F, TN))

    # Explicit VMEM budget: double-buffered x in + out (4x block) plus the
    # double-buffered scale block, with slack; capped for v7x's 64 MiB VMEM.
    block_x_bytes = BT * sub * TN * itemsize
    block_s_bytes = BT * _SCALE_PAD_BYTES
    vmem_limit = int(min(64 * 2**20,
                         max(32 * 2**20, 4 * block_x_bytes + 2 * block_s_bytes + (1 << 20))))

    out3 = pl.pallas_call(
        _drop_path_kernel,
        out_shape=jax.ShapeDtypeStruct((B, sub, F), x.dtype),
        grid_spec=pltpu.PrefetchScalarGridSpec(
            num_scalar_prefetch=0,
            grid=grid,
            in_specs=[
                pl.BlockSpec((BT, 1, 1), lambda bi, ni: (bi, 0, 0)),
                pl.BlockSpec((BT, sub, TN), lambda bi, ni: (bi, 0, ni)),
            ],
            out_specs=pl.BlockSpec((BT, sub, TN), lambda bi, ni: (bi, 0, ni)),
        ),
        compiler_params=pltpu.CompilerParams(
            dimension_semantics=("parallel", "parallel"),
            vmem_limit_bytes=vmem_limit,
        ),
    )(scale3, x3)

    if pad:
        out = out3.reshape(B, feat_p)[:, :feat].reshape(x.shape)
    else:
        out = out3.reshape(x.shape)         # free: no padding was added
    return out


if __name__ == "__main__":
    key = jax.random.PRNGKey(0)
    kx, kmask = jax.random.split(key)

    drop_prob = 0.25
    keep_prob = 1.0 - drop_prob

    def reference(x, key):
        # Pure-JAX reference with the same semantics as the PyTorch module.
        u = jax.random.uniform(key, (x.shape[0],), dtype=jnp.float32)
        s = (u < keep_prob).astype(jnp.float32) / keep_prob
        s = s.astype(x.dtype).reshape((-1,) + (1,) * (x.ndim - 1))
        return x * s

    # 1) NCHW f32, feat = 4*16*16 = 1024 -> zero-copy aligned path, 2-step grid.
    x = jax.random.normal(kx, (2, 4, 16, 16), dtype=jnp.float32)
    out = jax.block_until_ready(
        drop_path(x, drop_prob=drop_prob, scale_by_keep=True, training=True, key=kmask)
    )
    np.testing.assert_allclose(
        np.asarray(out), np.asarray(reference(x, kmask)), rtol=1e-6, atol=1e-6
    )

    # 2) Non-aligned feature count (feat = 3*10*10 = 300) -> padded fallback.
    x2 = jax.random.normal(kx, (2, 3, 10, 10), dtype=jnp.float32)
    out2 = jax.block_until_ready(
        drop_path(x2, drop_prob=drop_prob, scale_by_keep=True, training=True, key=kmask)
    )
    np.testing.assert_allclose(
        np.asarray(out2), np.asarray(reference(x2, kmask)), rtol=1e-6, atol=1e-6
    )

    # 3) bf16 input: dtype-aware sublanes (16) and native-dtype multiply.
    xb = x.astype(jnp.bfloat16)
    outb = jax.block_until_ready(
        drop_path(xb, drop_prob=drop_prob, scale_by_keep=True, training=True, key=kmask)
    )
    np.testing.assert_allclose(
        np.asarray(outb, dtype=np.float32),
        np.asarray(reference(xb, kmask), dtype=np.float32),
        rtol=1e-2, atol=1e-2,
    )

    # 4) Larger f32 case (feat = 8*32*32 = 8192) exercising the byte-based tiling.
    x4 = jax.random.normal(kx, (4, 8, 32, 32), dtype=jnp.float32)
    out4 = jax.block_until_ready(
        drop_path(x4, drop_prob=drop_prob, scale_by_keep=True, training=True, key=kmask)
    )
    np.testing.assert_allclose(
        np.asarray(out4), np.asarray(reference(x4, kmask)), rtol=1e-6, atol=1e-6
    )

    # 5) Eval / drop_prob==0 path: identity, no kernel launch.
    out_eval = drop_path(x, drop_prob=drop_prob, training=False, key=kmask)
    np.testing.assert_allclose(np.asarray(out_eval), np.asarray(x))

    print("KERNEL_OK")
</pallas_src>

<mosaic_0001>
module attributes {stable_mosaic.version = 11 : i64} {
  func.func @_drop_path_kernel(%arg0: i32, %arg1: i32, %arg2: memref<1x1x1xf32, #tpu.memory_space<vmem>>, %arg3: memref<1x8x128xf32, #tpu.memory_space<vmem>>, %arg4: memref<1x8x128xf32, #tpu.memory_space<vmem>>) attributes {dimension_semantics = [#tpu.dimension_semantics<parallel>, #tpu.dimension_semantics<parallel>], iteration_bounds = array<i64: 2, 1>, scalar_prefetch = 0 : i64, scratch_operands = 0 : i64, tpu.core_type = #tpu.core_type<tc>, window_params = [{transform_indices = @transform_0, window_bounds = array<i64: 1, 1, 1>}, {transform_indices = @transform_1, window_bounds = array<i64: 1, 8, 128>}, {transform_indices = @transform_2, window_bounds = array<i64: 1, 8, 128>}]} {
    %c0 = arith.constant 0 : index
    %c0_0 = arith.constant 0 : index
    %c0_1 = arith.constant 0 : index
    %0 = vector.load %arg3[%c0, %c0_0, %c0_1] : memref<1x8x128xf32, #tpu.memory_space<vmem>>, vector<1x8x128xf32>
    %c0_2 = arith.constant 0 : index
    %c0_3 = arith.constant 0 : index
    %c0_4 = arith.constant 0 : index
    %1 = vector.load %arg2[%c0_2, %c0_3, %c0_4] : memref<1x1x1xf32, #tpu.memory_space<vmem>>, vector<1x1x1xf32>
    %2 = vector.broadcast %1 : vector<1x1x1xf32> to vector<1x8x128xf32>
    %3 = arith.mulf %0, %2 : vector<1x8x128xf32>
    %c0_5 = arith.constant 0 : index
    %c0_6 = arith.constant 0 : index
    %c0_7 = arith.constant 0 : index
    %4 = vector.load %arg4[%c0_5, %c0_6, %c0_7] : memref<1x8x128xf32, #tpu.memory_space<vmem>>, vector<1x8x128xf32>
    tpu.vector_store %arg4[%c0_5, %c0_6, %c0_7], %3 {strides = array<i32>} : memref<1x8x128xf32, #tpu.memory_space<vmem>>, vector<1x8x128xf32>,
    return
  }
  func.func @transform_0(%arg0: i32, %arg1: i32) -> (i32, i32, i32) {
    %c0_i32 = arith.constant 0 : i32
    %c0_i32_0 = arith.constant 0 : i32
    %c0_i32_1 = arith.constant 0 : i32
    return %arg0, %c0_i32, %c0_i32_0 : i32, i32, i32
  }
  func.func @transform_1(%arg0: i32, %arg1: i32) -> (i32, i32, i32) {
    %c0_i32 = arith.constant 0 : i32
    %c0_i32_0 = arith.constant 0 : i32
    return %arg0, %c0_i32, %arg1 : i32, i32, i32
  }
  func.func @transform_2(%arg0: i32, %arg1: i32) -> (i32, i32, i32) {
    %c0_i32 = arith.constant 0 : i32
    %c0_i32_0 = arith.constant 0 : i32
    return %arg0, %c0_i32, %arg1 : i32, i32, i32
  }
}

</mosaic_0001>

<bundles_post_ra>
// kernel: tpu_custom_call.1
= control target key start
LH: loop header
LB: loop body
LE: loop exit
PB: predicated region body
PF: predicated region fallthrough
CT: control target
= control target key end

     0   :  { %7 = vsyncpa [#allocation3], 0  ;;  %s652_s0 = inlined_call_operand.vmem [shape: f32[2,1,1], index: 0, kind: input, shape index: {}]   ;;  %s653_s1 = inlined_call_operand.hbm [shape: f32[2,8,128], index: 1, kind: input, shape index: {}]   ;;  %s654_s2 = inlined_call_operand.hbm [shape: f32[2,8,128], index: 2, kind: output, shape index: {}]  }
   0x1   :  { %9 = vsyncpa [#allocation3 + $0x1], 0 }
   0x2   :  { %10 = vsyncpa [#allocation4], 0 }
   0x3   :  { %12 = vsyncpa [#allocation4 + $0x1], 0  ;;  %s513_s9 = smov 0   ;;  %s515_s10 = smov 0  }
   0x4   :  { %s517_s11 = smov 0   ;;  %s519_s12 = smov 0  }
   0x5   :  { %s521_s13 = smov 0   ;;  %s523_s14 = smov 0  }
   0x6 LB: > { %s307_s15 = sadd.s32 4294967295, %s493_s14   ;;  %s308_s16 = sadd.s32 4294967294, %s493_s14   ;;  %s493_s14 = sphi %s523_s14, %s18_s14   ;;  %s489_s13 = sphi %s521_s13, %s666_s13   ;;  %s485_s12 = sphi %s519_s12, %s665_s12   ;;  %s481_s11 = sphi %s517_s11, %s664_s11   ;;  %s477_s10 = sphi %s515_s10, %s663_s10   ;;  %s473_s9 = sphi %s513_s9, %s662_s9  }
   0x7   : > { %s30_s17 = sadd.s32 1, %s489_s13  ;;  %s65_s18 = sadd.s32 1, %s481_s11 }
   0x8   : > { %p32_p0 = scmp.ge.s32.totalorder %s30_s17, 2  ;;  %p72_p1 = scmp.ne.s32.totalorder %s481_s11, %s477_s10 }
   0x9   : > { %p73_p2 = scmp.eq.s32.totalorder %s493_s14, 0  ;;  %p78_p3 = scmp.ne.s32.totalorder %s477_s10, %s473_s9 }
   0xa   : > { %s668_s17 = smov (%p32_p0, %s30_s17), 0  ;;  %p79_p5 = scmp.eq.s32.totalorder %s307_s15, 0 }
   0xb   : > { %p554_p4 = por %p73_p2, %p72_p1  ;;  %s60_s20 = ssub.s32 %s489_s13, %s668_s17 }
   0xc   : > { %p104_p6 = scmp.eq.s32.totalorder %s307_s15, 1  ;;  %p63_p7 = scmp.eq.s32.totalorder %s60_s20, 0 }
   0xd   : > { %p560_p8 = por %p79_p5, %p78_p3  ;;  %p110_p10 = scmp.eq.s32.totalorder %s308_s16, 1 }
   0xe   : > { %p564_p9 = por %p104_p6, %p72_p1  ;;  %p333_p13 = scmp.lt.s32.totalorder %s493_s14, 2 }
   0xf   : > { %s569_s23 = scalar_select %p63_p7, %s481_s11, %s65_s18  }
  0x10   : > { %p571_p11 = por %p110_p10, %p78_p3  ;;  %s136_s25 = sand.u32 1, %s481_s11  }
  0x11   : > { %s311_s26 = sshll.u32 %s136_s25, 3  ;;  %s312_s27 = sshll.u32 %s489_s13, 7 }
  0x12   : > { %s658_s24 = scalar_select %p571_p11, 1, 0 }
  0x13   : > { %s146_s30 = scalar_lea.hbm %s653_s1, %s312_s27  ;;  %s140_s3 = scalar_lea.vmem [#allocation2], %s311_s26 }
  0x14   : > { %s148_s4 = sshll.u32 %s140_s3, 4  ;;  %p584_p0 = pnand %p333_p13, %p554_p4  ;;  %s149_s4 = int_to_ptr.vmem [resolvable:$true] %s148_s4 }
  0x15   : > { %p313_p1 = scmp.ge.s32.totalorder %s493_s14, 1  ;;  %p153_p2 = scmp.lt.s32.totalorder %s493_s14, 3 }
  0x16   : > { %s137_s6 = scalar_lea.sflag [#allocation3], %s136_s25  ;;  %p387_p3 = pneg %p584_p0 }
  0x17   : > { %s398_s7 = scalar_lea.vmem %s149_s4, 128  ;;  %s495_s8 = smov [#allocation2]  }
  0x18   : > { %p399_p5 = scmp.ne.s32.totalorder %s149_s4, %s398_s7  ;;  %s403_s15 = sshll.u32 %s495_s8, 4  ;;  %s404_s15 = int_to_ptr.vmem [resolvable:$false] %s403_s15 }
  0x19   : > { %s405_s16 = scalar_lea.vmem %s404_s15, 256  ;;  %p406_p10 = scmp.lt.s32.totalorder %s149_s4, %s404_s15 }
  0x1a   : > { %p401_p6 = pnand %p399_p5, %p387_p3  ;;  %p407_p12 = scmp.lt.s32.totalorder %s405_s16, %s398_s7 }
  0x1c   : > { %p402_p7 = pneg %p401_p6  ;;  %p408_p4 = por %p407_p12, %p406_p10 }
  0x1e   : > { %p409_p13 = pnand %p408_p4, %p402_p7 }
  0x20   : > { %412 = shalt.err (!%p409_p13)
}
  0x21   : > { %328 = dma.hbm_to_vmem [thread:$0]  (!%p584_p0), %s146_s30, 128, %s149_s4, %s137_s6  }
  0x22   : > { %p154_p11 = pnand %p313_p1, %p153_p2 }
  0x23   : > { %s599_s18 = sand.u32 (!%p154_p11), 1, %s477_s10  }
  0x24   : > { %157 = sbr.rel (%p154_p11) target bundleno = 187 (0xbb), region = 28  ;;  %s314_s19 = sshll.u32 (!%p154_p11), %s599_s18, 3 }
  0x25   : > { %s160_s20 = scalar_lea.sflag (!%p154_p11), [#allocation3], %s599_s18  ;;  %s163_s25 = scalar_lea.vmem (!%p154_p11), [#allocation2], %s314_s19 }
  0x29   : > { %464 = dma.done.wait (%p560_p8), %s160_s20, 128  }
  0x2a   : > { %466 = vsyncadd (%p560_p8), %s160_s20, 4294967168  ;;  %p187_p12 = scmp.lt.s32.totalorder %s485_s12, 1  ;;  %v496_v0 = vmov 0   ;;  %v190_v2 = vld [vmem:[%s163_s25] sm:$0xff]  ;;  %s318_s30 = sshll.u32 %s485_s12, 7 }
  0x2b   : > { %384 = vset.pattern.permute.xlu0 %v496_v0  ;;  %s186_s3 = scalar_lea.vmem [#allocation5], %s314_s19  ;;  %s216_s6 = scalar_lea.hbm %s654_s2, %s318_s30 }
  0x2c   : > { %s188_s26 = scalar_select %p187_p12, %s485_s12, 1 }
  0x2d   : > { %s218_s21 = sshll.u32 %s186_s3, 4  ;;  %s204_s7 = scalar_lea.sflag [#allocation4], %s599_s18  ;;  %s219_s21 = int_to_ptr.vmem [resolvable:$true] %s218_s21 }
  0x2e   : > { %s189_s29 = scalar_lea.vmem %s652_s0, %s188_s26  ;;  %s413_s8 = scalar_lea.vmem %s219_s21, 128 }
  0x2f   : > { %v316_v1 = vld [vmem:[%s189_s29] ss:$0 sm:$0xff]  ;;  %p414_p8 = scmp.ne.s32.totalorder %s219_s21, %s413_s8  ;;  %s497_s15 = smov [#allocation5]  }
  0x30   : > { %198 = vperm.xlu0 %384, %v316_v1   ;;  %s417_s16 = sshll.u32 %s497_s15, 4  ;;  %s418_s16 = int_to_ptr.vmem [resolvable:$false] %s417_s16 }
  0x31   : > { %p415_p11 = pnand %p414_p8, %p564_p9  ;;  %s419_s12 = scalar_lea.vmem %s418_s16, 256 }
  0x32   : > { %p420_p1 = scmp.lt.s32.totalorder %s219_s21, %s418_s16  ;;  %p421_p2 = scmp.lt.s32.totalorder %s419_s12, %s413_s8 }
  0x33   : > { %p416_p0 = pneg %p415_p11 }
  0x34   : > { %p422_p3 = por %p421_p2, %p420_p1 }
  0x36   : > { %p423_p5 = pnand %p422_p3, %p416_p0 }
  0xab   : > { %v199_v3 = vpop.permute.xlu0 %198 }
  0xac   : > { %v201_v4 = vmul.f32 %v199_v3, %v190_v2 }
  0xae   : > { %202 = vst [vmem:[%s186_s3] sm:$0xff] %v201_v4 }
  0xaf   : > { %426 = shalt.err (!%p423_p5)
}
  0xb0   : > { %s427_s19 = scalar_lea.hbm %s216_s6, 128  ;;  %s431_s25 = scalar_lea.hbm %s654_s2, 256 }
  0xb1   : > { %p428_p6 = scmp.ne.s32.totalorder %s216_s6, %s427_s19  ;;  %p432_p4 = scmp.lt.s32.totalorder %s216_s6, %s654_s2 }
  0xb2   : > { %p433_p13 = scmp.lt.s32.totalorder %s431_s25, %s427_s19 }
  0xb3   : > { %p429_p7 = pnand %p428_p6, %p564_p9 }
  0xb4   : > { %p434_p12 = por %p433_p13, %p432_p4 }
  0xb5   : > { %p430_p10 = pneg %p429_p7 }
  0xb7   : > { %p435_p8 = pnand %p434_p12, %p430_p10 }
  0xb9   : > { %438 = shalt.err (!%p435_p8)
}
  0xba   : > { %323 = dma.vmem_to_hbm [thread:$0]  (%p564_p9), %s219_s21, 128, %s216_s6, %s204_s7  }
  0xbb PF: > { %s230_s28 = sand.u32 1, %s473_s9   ;;  %p660_p11 = scmp.ne.s32.totalorder %s658_s24, 0 }
  0xbc   : > { %p661_p0 = scmp.ge.s32.totalorder %s493_s14, 2  ;;  %s231_s29 = scalar_lea.sflag [#allocation4], %s230_s28 }
  0xbe   : > { %p330_p1 = pnand %p661_p0, %p660_p11 }
  0xc0   : > { %p331_p2 = pneg %p330_p1 }
  0xc2   : > { %468 = dma.done.wait (%p331_p2), %s231_s29, 128  }
  0xc3   : > { %470 = vsyncadd (%p331_p2), %s231_s29, 4294967168  ;;  %s18_s14 = sadd.s32 1, %s493_s14   ;;  %s662_s9 = smov %s477_s10 }
  0xc4   : > { %p15_p3 = scmp.ge.s32.totalorder %s18_s14, 4   ;;  %s663_s10 = smov %s481_s11 }
  0xc5   : > { %s664_s11 = smov %s569_s23  ;;  %s665_s12 = smov %s489_s13 }
  0xc6   : > { %s666_s13 = smov %s668_s17  ;;  %17 = sbr.rel (!%p15_p3) target bundleno = 6 (0x6), region = 76 }
  0xcb   :  { %236 = vsyncpa [#allocation3], 1 }
  0xcc   :  { %238 = vsyncpa [#allocation3 + $0x1], 1 }
  0xcd   :  { %239 = vsyncpa [#allocation4], 1 }
  0xce   :  { %241 = vsyncpa [#allocation4 + $0x1], 1 }

</bundles_post_ra>
